<compile_context>
chip_gen: v6e
topology: v6e:2x2x1
jax: 0.10.0
libtpu: 0.0.40
codegen_flags: <defaults>
</compile_context>

<pallas_src>
import functools

import jax
import jax.numpy as jnp
from jax import lax
from jax.experimental import pallas as pl
from jax.experimental.pallas import tpu as pltpu


def _round_up(x, m):
    return (x + m - 1) // m * m


def _pad2(a, rows, cols):
    return jnp.pad(a, ((0, rows - a.shape[0]), (0, cols - a.shape[1])))


def _vmem_budget_bytes():
    """Generation-aware VMEM budget: leave ~1/8 of capacity as headroom.

    v5e/v6e (128 MiB) -> ~112 MiB, v7x (64 MiB per TC) -> ~56 MiB.
    """
    try:
        cap = int(pltpu.get_tpu_info().vmem_capacity_bytes)
    except Exception:
        cap = 64 << 20  # conservative per-TC fallback (v7x)
    return max(cap - cap // 8, 16 << 20)


# ---------------------------------------------------------------------------
# Kernel 1: fc1 (bf16 MXU, K-tiled with f32 accumulator) + per-batch-tile
#           partial batch statistics (sum, sum of squares) from the f32 acc.
# ---------------------------------------------------------------------------
def _fc1_stats_kernel(x_ref, w1_ref, h_ref, stats_ref, acc_ref):
    # x_ref: (TB, FK) bf16     w1_ref: (FK, H_pad) bf16
    # h_ref: (TB, H_pad) bf16  stats_ref: (1, 2, H_pad) f32  [sum ; sum of sq]
    # acc_ref: (TB, H_pad) f32 scratch accumulator over the K grid axis
    k = pl.program_id(1)

    @pl.when(k == 0)
    def _():
        acc_ref[...] = jnp.zeros_like(acc_ref)

    acc_ref[...] += jnp.dot(x_ref[...], w1_ref[...],
                            preferred_element_type=jnp.float32)

    @pl.when(k == pl.num_programs(1) - 1)
    def _():
        h = acc_ref[...]                                   # full-precision f32
        h_ref[...] = h.astype(h_ref.dtype)                 # bf16 to HBM
        # Two direct sub-stores (no concatenate / extra VMEM copy).
        stats_ref[0, 0:1, :] = jnp.sum(h, axis=0, keepdims=True)
        stats_ref[0, 1:2, :] = jnp.sum(h * h, axis=0, keepdims=True)


# ---------------------------------------------------------------------------
# Kernel 2: apply precomputed BN scale/shift + ReLU + fc2 (bf16 MXU).
# ---------------------------------------------------------------------------
def _bn_relu_fc2_kernel(h_ref, ss_ref, w2_ref, b2_ref, o_ref):
    # h_ref: (TB, H_pad) bf16
    # ss_ref: (2, H_pad) f32 rows = [scale ; shift] (precomputed once outside)
    # w2_ref: (H_pad, C_pad) bf16  b2_ref: (1, C_pad) f32  o_ref: (TB, C_pad) f32
    scale = ss_ref[0:1, :]
    shift = ss_ref[1:2, :]
    a = jnp.maximum(h_ref[...].astype(jnp.float32) * scale + shift,
                    0.0).astype(jnp.bfloat16)
    o_ref[...] = (jnp.dot(a, w2_ref[...], preferred_element_type=jnp.float32)
                  + b2_ref[...]).astype(o_ref.dtype)


# ---------------------------------------------------------------------------
# Wrapper
# ---------------------------------------------------------------------------
def mlp_classifier_forward(x, w1, b1, gamma, beta, w2, b2, *, batch_tile=256):
    """x: (B, in_channels, num_electrodes) or (B, F). Returns (B, num_classes).

    b1 is accepted for interface parity with the PyTorch module but is unused:
    train-mode BatchNorm's mean subtraction cancels it exactly.
    """
    del b1  # mathematically cancelled by the BN mean subtraction (train mode)

    B = x.shape[0]
    x2d = x.reshape(B, -1).astype(jnp.float32)             # == torch x.view(B,-1)
    F_in = x2d.shape[1]
    H = w1.shape[1]
    C = w2.shape[1]

    f32b, bf16b = 4, 2
    budget = _vmem_budget_bytes()

    H_pad = _round_up(H, 128)
    C_pad = _round_up(C, 128)

    # --- K (feature) tiling for fc1: keep the W1 block <= ~1/4 of budget -----
    F_pad128 = _round_up(F_in, 128)
    max_fk = max(128, ((budget // 4) // (H_pad * bf16b)) // 128 * 128)
    FK = min(F_pad128, max_fk)
    F_pad = _round_up(F_in, FK)
    nk = F_pad // FK

    # --- Batch tiling: 16-row alignment for bf16 (16,128) native tiling ------
    TB = _round_up(min(batch_tile, _round_up(B, 16)), 16)

    def _tile_footprint(tb):
        return (2 * (tb * FK * bf16b + FK * H_pad * bf16b)      # call-1 inputs (x2 buf)
                + tb * H_pad * f32b                             # acc scratch
                + 2 * (tb * H_pad * bf16b + 2 * H_pad * f32b)   # call-1 outputs
                + 2 * tb * H_pad * bf16b                        # call-2 h input
                + H_pad * C_pad * bf16b + C_pad * f32b          # W2, b2 resident
                + 2 * tb * C_pad * f32b)                        # call-2 output

    while TB > 16 and _tile_footprint(TB) > budget:
        TB = _round_up(TB // 2, 16)

    B_pad = _round_up(B, TB)
    nb = B_pad // TB

    # Padded / packed operands (zeros in padding keep BN stats & matmuls exact).
    x_p = _pad2(x2d, B_pad, F_pad).astype(jnp.bfloat16)
    w1_p = _pad2(w1.astype(jnp.float32), F_pad, H_pad).astype(jnp.bfloat16)
    w2_p = _pad2(w2.astype(jnp.float32), H_pad, C_pad).astype(jnp.bfloat16)
    b2_p = jnp.pad(b2.astype(jnp.float32), (0, C_pad - C)).reshape(1, C_pad)

    # ----- call 1: fc1 (K-tiled) + per-batch-tile partial stats --------------
    vmem1 = int(min(max(_tile_footprint(TB) + (2 << 20), 8 << 20), budget))
    cost1 = pl.CostEstimate(
        flops=int(2 * B_pad * F_pad * H_pad),
        transcendentals=0,
        bytes_accessed=int(B_pad * F_pad * bf16b + nb * F_pad * H_pad * bf16b
                           + B_pad * H_pad * bf16b + nb * 2 * H_pad * f32b),
    )
    h, partial_stats = pl.pallas_call(
        _fc1_stats_kernel,
        out_shape=(jax.ShapeDtypeStruct((B_pad, H_pad), jnp.bfloat16),
                   jax.ShapeDtypeStruct((nb, 2, H_pad), jnp.float32)),
        grid=(nb, nk),
        in_specs=[
            pl.BlockSpec((TB, FK), lambda i, k: (i, k)),
            pl.BlockSpec((FK, H_pad), lambda i, k: (k, 0)),
        ],
        out_specs=(
            pl.BlockSpec((TB, H_pad), lambda i, k: (i, 0)),
            pl.BlockSpec((1, 2, H_pad), lambda i, k: (i, 0, 0)),
        ),
        scratch_shapes=[pltpu.VMEM((TB, H_pad), jnp.float32)],
        compiler_params=pltpu.CompilerParams(
            dimension_semantics=("parallel", "arbitrary"),
            vmem_limit_bytes=vmem1),
        cost_estimate=cost1,
    )(x_p, w1_p)

    # --- XLA glue: combine tile stats; compute BN scale/shift exactly once ---
    # (padded batch rows are zero so dividing by B is exact; padded H columns
    #  get gamma=beta=0 -> scale=shift=0 -> ReLU output 0 -> no fc2 contribution)
    stats = jnp.sum(partial_stats, axis=0)                  # (2, H_pad)
    inv_b = 1.0 / float(B)
    mean = stats[0] * inv_b
    var = jnp.maximum(stats[1] * inv_b - mean * mean, 0.0)  # one-pass biased var
    inv_std = lax.rsqrt(var + 1e-5)
    gamma_p = jnp.pad(gamma.astype(jnp.float32), (0, H_pad - H))
    beta_p = jnp.pad(beta.astype(jnp.float32), (0, H_pad - H))
    scale = gamma_p * inv_std
    shift = beta_p - mean * scale
    ss = jnp.stack([scale, shift])                          # (2, H_pad)

    # ----- call 2: scale/shift + ReLU + fc2 -----------------------------------
    vmem2 = int(min(max(2 * TB * H_pad * bf16b + 2 * H_pad * f32b
                        + H_pad * C_pad * bf16b + C_pad * f32b
                        + 2 * TB * C_pad * f32b + (2 << 20), 8 << 20), budget))
    cost2 = pl.CostEstimate(
        flops=int(2 * B_pad * H_pad * C_pad + 4 * B_pad * H_pad),
        transcendentals=0,
        bytes_accessed=int(B_pad * H_pad * bf16b + 2 * H_pad * f32b
                           + H_pad * C_pad * bf16b + C_pad * f32b
                           + B_pad * C_pad * f32b),
    )
    out_p = pl.pallas_call(
        _bn_relu_fc2_kernel,
        out_shape=jax.ShapeDtypeStruct((B_pad, C_pad), jnp.float32),
        grid=(nb,),
        in_specs=[
            pl.BlockSpec((TB, H_pad), lambda i: (i, 0)),
            pl.BlockSpec((2, H_pad), lambda i: (0, 0)),
            pl.BlockSpec((H_pad, C_pad), lambda i: (0, 0)),
            pl.BlockSpec((1, C_pad), lambda i: (0, 0)),
        ],
        out_specs=pl.BlockSpec((TB, C_pad), lambda i: (i, 0)),
        compiler_params=pltpu.CompilerParams(
            dimension_semantics=("parallel",),
            vmem_limit_bytes=vmem2),
        cost_estimate=cost2,
    )(h, ss, w2_p, b2_p)

    return out_p[:B, :C]


if __name__ == "__main__":
    batch = 32
    in_channels = 4
    num_electrodes = 16
    hidden_dim = 32
    num_classes = 2
    feat = in_channels * num_electrodes

    key = jax.random.PRNGKey(0)
    kx, kw1, kb1, kg, kbt, kw2, kb2 = jax.random.split(key, 7)

    # Deterministic synthetic parameters (PyTorch Linear weight is (out, in);
    # we store the transposed (in, out) layout for the kernel).
    x = jax.random.normal(kx, (batch, in_channels, num_electrodes), jnp.float32)
    w1 = jax.random.normal(kw1, (feat, hidden_dim), jnp.float32) * 0.1
    b1 = jax.random.normal(kb1, (hidden_dim,), jnp.float32) * 0.1
    gamma = 1.0 + 0.1 * jax.random.normal(kg, (hidden_dim,), jnp.float32)
    beta = 0.1 * jax.random.normal(kbt, (hidden_dim,), jnp.float32)
    w2 = jax.random.normal(kw2, (hidden_dim, num_classes), jnp.float32) * 0.1
    b2 = jax.random.normal(kb2, (num_classes,), jnp.float32) * 0.1

    fwd = jax.jit(mlp_classifier_forward, static_argnames=("batch_tile",))
    out = fwd(x, w1, b1, gamma, beta, w2, b2, batch_tile=16)  # 2 batch tiles
    out = jax.block_until_ready(out)

    # Pure-JAX f32 reference with exact PyTorch semantics (fc1 bias included,
    # BatchNorm1d train mode: biased batch variance, eps=1e-5).
    xf = x.reshape(batch, -1)
    h_ref = xf @ w1 + b1
    mu = h_ref.mean(axis=0, keepdims=True)
    var = ((h_ref - mu) ** 2).mean(axis=0, keepdims=True)
    hn = (h_ref - mu) / jnp.sqrt(var + 1e-5) * gamma + beta
    ref = jnp.maximum(hn, 0.0) @ w2 + b2

    assert out.shape == (batch, num_classes)
    # Kernel uses bf16 MXU operands and a bf16 intermediate h (f32 accumulation
    # and f32 batch statistics), so compare loosely.
    assert jnp.allclose(out, ref, atol=5e-2, rtol=5e-2), "mismatch vs reference"

    print("KERNEL_OK")
</pallas_src>

<mosaic_0001>
module attributes {stable_mosaic.version = 11 : i64} {
  func.func @_bn_relu_fc2_kernel(%arg0: i32, %arg1: memref<16x128xbf16, #tpu.memory_space<vmem>>, %arg2: memref<2x128xf32, #tpu.memory_space<vmem>>, %arg3: memref<128x128xbf16, #tpu.memory_space<vmem>>, %arg4: memref<1x128xf32, #tpu.memory_space<vmem>>, %arg5: memref<16x128xf32, #tpu.memory_space<vmem>>) attributes {dimension_semantics = [#tpu.dimension_semantics<parallel>], iteration_bounds = array<i64: 2>, scalar_prefetch = 0 : i64, scratch_operands = 0 : i64, tpu.core_type = #tpu.core_type<tc>, window_params = [{transform_indices = @transform_0, window_bounds = array<i64: 16, 128>}, {pipeline_mode = #tpu.pipeline_mode<synchronous>, transform_indices = @transform_1, window_bounds = array<i64: 2, 128>}, {pipeline_mode = #tpu.pipeline_mode<synchronous>, transform_indices = @transform_2, window_bounds = array<i64: 128, 128>}, {pipeline_mode = #tpu.pipeline_mode<synchronous>, transform_indices = @transform_3, window_bounds = array<i64: 1, 128>}, {transform_indices = @transform_4, window_bounds = array<i64: 16, 128>}]} {
    %c0 = arith.constant 0 : index
    %c0_0 = arith.constant 0 : index
    %0 = vector.load %arg2[%c0, %c0_0] : memref<2x128xf32, #tpu.memory_space<vmem>>, vector<1x128xf32>
    %c1 = arith.constant 1 : index
    %c0_1 = arith.constant 0 : index
    %1 = vector.load %arg2[%c1, %c0_1] : memref<2x128xf32, #tpu.memory_space<vmem>>, vector<1x128xf32>
    %c0_2 = arith.constant 0 : index
    %c0_3 = arith.constant 0 : index
    %2 = vector.load %arg1[%c0_2, %c0_3] : memref<16x128xbf16, #tpu.memory_space<vmem>>, vector<16x128xbf16>
    %3 = arith.extf %2 : vector<16x128xbf16> to vector<16x128xf32>
    %4 = vector.broadcast %0 : vector<1x128xf32> to vector<16x128xf32>
    %5 = arith.mulf %3, %4 : vector<16x128xf32>
    %6 = vector.broadcast %1 : vector<1x128xf32> to vector<16x128xf32>
    %7 = arith.addf %5, %6 : vector<16x128xf32>
    %cst = arith.constant 0.000000e+00 : f32
    %8 = vector.broadcast %cst : f32 to vector<16x128xf32>
    %9 = arith.maximumf %7, %8 : vector<16x128xf32>
    %10 = arith.truncf %9 : vector<16x128xf32> to vector<16x128xbf16>
    %c0_4 = arith.constant 0 : index
    %c0_5 = arith.constant 0 : index
    %11 = vector.load %arg3[%c0_4, %c0_5] : memref<128x128xbf16, #tpu.memory_space<vmem>>, vector<128x128xbf16>
    %cst_6 = arith.constant dense<0.000000e+00> : vector<16x128xf32>
    %12 = tpu.matmul %10, %11, %cst_6 {dimension_numbers = #tpu.dot_dimension_numbers<[1], [0], [0], [1], [0, 0, 1, 1], [], []>} : vector<16x128xbf16>, vector<128x128xbf16>, vector<16x128xf32> -> vector<16x128xf32>
    %c0_7 = arith.constant 0 : index
    %c0_8 = arith.constant 0 : index
    %13 = vector.load %arg4[%c0_7, %c0_8] : memref<1x128xf32, #tpu.memory_space<vmem>>, vector<1x128xf32>
    %14 = vector.broadcast %13 : vector<1x128xf32> to vector<16x128xf32>
    %15 = arith.addf %12, %14 : vector<16x128xf32>
    %c0_9 = arith.constant 0 : index
    %c0_10 = arith.constant 0 : index
    %16 = vector.load %arg5[%c0_9, %c0_10] : memref<16x128xf32, #tpu.memory_space<vmem>>, vector<16x128xf32>
    tpu.vector_store %arg5[%c0_9, %c0_10], %15 {strides = array<i32>} : memref<16x128xf32, #tpu.memory_space<vmem>>, vector<16x128xf32>,
    return
  }
  func.func @transform_0(%arg0: i32) -> (i32, i32) {
    %c0_i32 = arith.constant 0 : i32
    %c0_i32_0 = arith.constant 0 : i32
    return %arg0, %c0_i32 : i32, i32
  }
  func.func @transform_1(%arg0: i32) -> (i32, i32) {
    %c0_i32 = arith.constant 0 : i32
    %c0_i32_0 = arith.constant 0 : i32
    %c0_i32_1 = arith.constant 0 : i32
    return %c0_i32, %c0_i32_0 : i32, i32
  }
  func.func @transform_2(%arg0: i32) -> (i32, i32) {
    %c0_i32 = arith.constant 0 : i32
    %c0_i32_0 = arith.constant 0 : i32
    %c0_i32_1 = arith.constant 0 : i32
    return %c0_i32, %c0_i32_0 : i32, i32
  }
  func.func @transform_3(%arg0: i32) -> (i32, i32) {
    %c0_i32 = arith.constant 0 : i32
    %c0_i32_0 = arith.constant 0 : i32
    %c0_i32_1 = arith.constant 0 : i32
    return %c0_i32, %c0_i32_0 : i32, i32
  }
  func.func @transform_4(%arg0: i32) -> (i32, i32) {
    %c0_i32 = arith.constant 0 : i32
    %c0_i32_0 = arith.constant 0 : i32
    return %arg0, %c0_i32 : i32, i32
  }
}

module attributes {stable_mosaic.version = 11 : i64} {
  func.func @_fc1_stats_kernel(%arg0: i32, %arg1: i32, %arg2: memref<16x128xbf16, #tpu.memory_space<vmem>>, %arg3: memref<128x128xbf16, #tpu.memory_space<vmem>>, %arg4: memref<16x128xbf16, #tpu.memory_space<vmem>>, %arg5: memref<1x2x128xf32, #tpu.memory_space<vmem>>, %arg6: memref<16x128xf32, #tpu.memory_space<vmem>>) attributes {dimension_semantics = [#tpu.dimension_semantics<parallel>, #tpu.dimension_semantics<arbitrary>], iteration_bounds = array<i64: 2, 1>, scalar_prefetch = 0 : i64, scratch_operands = 1 : i64, tpu.core_type = #tpu.core_type<tc>, window_params = [{transform_indices = @transform_0, window_bounds = array<i64: 16, 128>}, {transform_indices = @transform_1, window_bounds = array<i64: 128, 128>}, {transform_indices = @transform_2, window_bounds = array<i64: 16, 128>}, {transform_indices = @transform_3, window_bounds = array<i64: 1, 2, 128>}]} {
    %c0_i32 = arith.constant 0 : i32
    %0 = arith.cmpi eq, %arg1, %c0_i32 : i32
    %1 = arith.extui %0 : i1 to i32
    %c0_i32_0 = arith.constant 0 : i32
    %2 = arith.cmpi ne, %1, %c0_i32_0 : i32
    scf.if %2 {
      %cst_10 = arith.constant 0.000000e+00 : f32
      %12 = vector.broadcast %cst_10 : f32 to vector<16x128xf32>
      %c0_11 = arith.constant 0 : index
      %c0_12 = arith.constant 0 : index
      %13 = vector.load %arg6[%c0_11, %c0_12] : memref<16x128xf32, #tpu.memory_space<vmem>>, vector<16x128xf32>
      tpu.vector_store %arg6[%c0_11, %c0_12], %12 {strides = array<i32>} : memref<16x128xf32, #tpu.memory_space<vmem>>, vector<16x128xf32>,
    } else {
    }
    %c0 = arith.constant 0 : index
    %c0_1 = arith.constant 0 : index
    %3 = vector.load %arg6[%c0, %c0_1] : memref<16x128xf32, #tpu.memory_space<vmem>>, vector<16x128xf32>
    %c0_2 = arith.constant 0 : index
    %c0_3 = arith.constant 0 : index
    %4 = vector.load %arg2[%c0_2, %c0_3] : memref<16x128xbf16, #tpu.memory_space<vmem>>, vector<16x128xbf16>
    %c0_4 = arith.constant 0 : index
    %c0_5 = arith.constant 0 : index
    %5 = vector.load %arg3[%c0_4, %c0_5] : memref<128x128xbf16, #tpu.memory_space<vmem>>, vector<128x128xbf16>
    %cst = arith.constant dense<0.000000e+00> : vector<16x128xf32>
    %6 = tpu.matmul %4, %5, %cst {dimension_numbers = #tpu.dot_dimension_numbers<[1], [0], [0], [1], [0, 0, 1, 1], [], []>} : vector<16x128xbf16>, vector<128x128xbf16>, vector<16x128xf32> -> vector<16x128xf32>
    %7 = arith.addf %3, %6 : vector<16x128xf32>
    %c0_6 = arith.constant 0 : index
    %c0_7 = arith.constant 0 : index
    %8 = vector.load %arg6[%c0_6, %c0_7] : memref<16x128xf32, #tpu.memory_space<vmem>>, vector<16x128xf32>
    tpu.vector_store %arg6[%c0_6, %c0_7], %7 {strides = array<i32>} : memref<16x128xf32, #tpu.memory_space<vmem>>, vector<16x128xf32>,
    %c0_i32_8 = arith.constant 0 : i32
    %9 = arith.cmpi eq, %arg1, %c0_i32_8 : i32
    %10 = arith.extui %9 : i1 to i32
    %c0_i32_9 = arith.constant 0 : i32
    %11 = arith.cmpi ne, %10, %c0_i32_9 : i32
    scf.if %11 {
      %c0_10 = arith.constant 0 : index
      %c0_11 = arith.constant 0 : index
      %12 = vector.load %arg6[%c0_10, %c0_11] : memref<16x128xf32, #tpu.memory_space<vmem>>, vector<16x128xf32>
      %13 = arith.truncf %12 : vector<16x128xf32> to vector<16x128xbf16>
      %c0_12 = arith.constant 0 : index
      %c0_13 = arith.constant 0 : index
      %14 = vector.load %arg4[%c0_12, %c0_13] : memref<16x128xbf16, #tpu.memory_space<vmem>>, vector<16x128xbf16>
      tpu.vector_store %arg4[%c0_12, %c0_13], %13 {strides = array<i32>} : memref<16x128xbf16, #tpu.memory_space<vmem>>, vector<16x128xbf16>,
      %cst_14 = arith.constant dense<0.000000e+00> : vector<128xf32>
      %15 = vector.multi_reduction <add>, %12, %cst_14 [0] : vector<16x128xf32> to vector<128xf32>
      %16 = vector.shape_cast %15 : vector<128xf32> to vector<1x128xf32>
      %c0_15 = arith.constant 0 : index
      %c0_16 = arith.constant 0 : index
      %c0_17 = arith.constant 0 : index
      %17 = vector.load %arg5[%c0_15, %c0_16, %c0_17] : memref<1x2x128xf32, #tpu.memory_space<vmem>>, vector<1x1x128xf32>
      %18 = vector.shape_cast %17 : vector<1x1x128xf32> to vector<1x128xf32>
      %19 = vector.shape_cast %16 : vector<1x128xf32> to vector<1x1x128xf32>
      tpu.vector_store %arg5[%c0_15, %c0_16, %c0_17], %19 {strides = array<i32>} : memref<1x2x128xf32, #tpu.memory_space<vmem>>, vector<1x1x128xf32>,
      %20 = arith.mulf %12, %12 : vector<16x128xf32>
      %cst_18 = arith.constant dense<0.000000e+00> : vector<128xf32>
      %21 = vector.multi_reduction <add>, %20, %cst_18 [0] : vector<16x128xf32> to vector<128xf32>
      %22 = vector.shape_cast %21 : vector<128xf32> to vector<1x128xf32>
      %c0_19 = arith.constant 0 : index
      %c1 = arith.constant 1 : index
      %c0_20 = arith.constant 0 : index
      %23 = vector.load %arg5[%c0_19, %c1, %c0_20] : memref<1x2x128xf32, #tpu.memory_space<vmem>>, vector<1x1x128xf32>
      %24 = vector.shape_cast %23 : vector<1x1x128xf32> to vector<1x128xf32>
      %25 = vector.shape_cast %22 : vector<1x128xf32> to vector<1x1x128xf32>
      tpu.vector_store %arg5[%c0_19, %c1, %c0_20], %25 {strides = array<i32>} : memref<1x2x128xf32, #tpu.memory_space<vmem>>, vector<1x1x128xf32>,
    } else {
    }
    return
  }
  func.func @transform_0(%arg0: i32, %arg1: i32) -> (i32, i32) {
    %c0_i32 = arith.constant 0 : i32
    return %arg0, %arg1 : i32, i32
  }
  func.func @transform_1(%arg0: i32, %arg1: i32) -> (i32, i32) {
    %c0_i32 = arith.constant 0 : i32
    %c0_i32_0 = arith.constant 0 : i32
    return %arg1, %c0_i32 : i32, i32
  }
  func.func @transform_2(%arg0: i32, %arg1: i32) -> (i32, i32) {
    %c0_i32 = arith.constant 0 : i32
    %c0_i32_0 = arith.constant 0 : i32
    return %arg0, %c0_i32 : i32, i32
  }
  func.func @transform_3(%arg0: i32, %arg1: i32) -> (i32, i32, i32) {
    %c0_i32 = arith.constant 0 : i32
    %c0_i32_0 = arith.constant 0 : i32
    %c0_i32_1 = arith.constant 0 : i32
    return %arg0, %c0_i32, %c0_i32_0 : i32, i32, i32
  }
}

</mosaic_0001>

<bundles_post_ra>
// kernel: mlp_classifier_forward.2
= control target key start
LH: loop header
LB: loop body
LE: loop exit
PB: predicated region body
PF: predicated region fallthrough
CT: control target
= control target key end

     0   :  { %s644_s12 = smov 0   ;;  %s646_s13 = smov 0   ;;  %s709_s0 = inlined_call_operand.vmem [shape: bf16[32,128], index: 0, kind: input, shape index: {}]   ;;  %s710_s1 = inlined_call_operand.vmem [shape: bf16[128,128], index: 1, kind: input, shape index: {}]   ;;  %s711_s2 = inlined_call_operand.vmem [shape: bf16[32,128], index: 2, kind: output, shape index: {0}]   ;;  %s712_s3 = inlined_call_operand.vmem [shape: f32[2,2,128], index: 3, kind: output, shape index: {1}]  }
   0x1   :  { %s648_s14 = smov 0  }
   0x2 LB: > { %s26_s15 = sadd.s32 1, %s616_s13  ;;  %p508_p0 = scmp.ge.s32.totalorder %s620_s14, 1  ;;  %s620_s14 = sphi %s648_s14, %s14_s14   ;;  %s616_s13 = sphi %s646_s13, %s714_s13   ;;  %s612_s12 = sphi %s644_s12, %s713_s12  }
   0x3   : > { %p28_p1 = scmp.ge.s32.totalorder %s26_s15, 2  ;;  %p169_p2 = scmp.lt.s32.totalorder %s620_s14, 3 }
   0x5   : > { %s716_s15 = smov (%p28_p1, %s26_s15), 0  ;;  %p170_p3 = pnand %p508_p0, %p169_p2 }
   0x6   : > { %s509_s20 = sshll.u32 (!%p170_p3), %s612_s12, 1  ;;  %p226_p5 = scmp.lt.s32.totalorder (!%p170_p3), %s612_s12, 1 }
   0x7   : > { %173 = sbr.rel (%p170_p3) target bundleno = 259 (0x103), region = 28  ;;  %p206_p4 = scmp.lt.s32.totalorder (!%p170_p3), %s509_s20, 3 }
   0xc   : > { %v589_v0 = vld [vmem:[%s710_s1 + $0x38] sm:$0xff]   ;;  %v622_v1 = vmov 0.0   ;;  %v590_v2 = vld [vmem:[%s710_s1 + $0x30] sm:$0xff]   ;;  %vm623_vm0 = vmmov 0   ;;  %s718_s20 = smov (!%p206_p4, %s509_s20), 3  ;;  %v591_v3 = vld [vmem:[%s710_s1 + $0x28] sm:$0xff]  }
   0xd   : > { %543 = vmatprep.subr.bf16.mxu0 %v622_v1  ;;  %559 = vmatprep.mubr.msk.bf16.mxu0 %vm623_vm0, %v622_v1  ;;  %s510_s23 = sshll.u32 %s718_s20, 2  ;;  %v592_v4 = vld [vmem:[%s710_s1 + $0x20] sm:$0xff]   ;;  %v593_v5 = vld [vmem:[%s710_s1 + $0x18] sm:$0xff]   ;;  %v594_v6 = vld [vmem:[%s710_s1 + $0x10] sm:$0xff]   ;;  %s720_s12 = smov (!%p226_p5, %s612_s12), 1 }
   0xe   : > { %544 = vmatpush3.bf16.msra.mxu0 %v589_v0  ;;  %s212_s26 = scalar_lea.vmem %s709_s0, %s510_s23  ;;  %v595_v7 = vld [vmem:[%s710_s1 + $0x8] sm:$0xff]   ;;  %v596_v8 = vld [vmem:[%s710_s1] sm:$0xff]   ;;  %s224_s16 = scalar_lea.vmem %s711_s2, %s510_s23 }
   0xf   : > { %545 = vmatprep.subr.bf16.mxu0 %v622_v1  ;;  %v597_v9 = vld [vmem:[%s212_s26] sm:$0xff]   ;;  %s513_s17 = sshll.u32 %s720_s12, 1 }
  0x10   : > { %s229_s20 = scalar_lea.vmem %s712_s3, %s513_s17 }
  0x12   : > { %546 = vmatpush3.bf16.msra.mxu0 %v590_v2 }
  0x13   : > { %547 = vmatprep.subr.bf16.mxu0 %v622_v1 }
  0x16   : > { %548 = vmatpush3.bf16.msra.mxu0 %v591_v3 }
  0x17   : > { %549 = vmatprep.subr.bf16.mxu0 %v622_v1 }
  0x1a   : > { %550 = vmatpush3.bf16.msra.mxu0 %v592_v4 }
  0x1b   : > { %551 = vmatprep.subr.bf16.mxu0 %v622_v1 }
  0x1e   : > { %552 = vmatpush3.bf16.msra.mxu0 %v593_v5 }
  0x1f   : > { %553 = vmatprep.subr.bf16.mxu0 %v622_v1 }
  0x22   : > { %554 = vmatpush3.bf16.msra.mxu0 %v594_v6 }
  0x23   : > { %555 = vmatprep.subr.bf16.mxu0 %v622_v1 }
  0x26   : > { %556 = vmatpush3.bf16.msra.mxu0 %v595_v7 }
  0x27   : > { %557 = vmatprep.subr.bf16.mxu0 %v622_v1 }
  0x2a   : > { %558 = vmatpush3.bf16.msra.mxu0 %v596_v8 }
  0x2d   : > { %560 = vmatmul.mubr.bf16.vlgmr.msra.gmra.mxu0 %v597_v9 }
  0xed   : > { %v345_v10 = vpop.f32.mrf.mxu0 }
  0xee   : > { %v379_v13 = vmul.f32 %v345_v10, %v345_v10 }
  0xef   : > { %v561_v11 = vpop.f32.mrf.mxu0 }
  0xf1   : > { %v348_v12 = vpop.f32.mrf.mxu0 }
  0xf2   : > { %v532_v14 = vpack.c.bf16 %v348_v12, %v345_v10  ;;  %v371_v15 = vadd.f32 %v348_v12, %v345_v10  ;;  %v380_v16 = vmul.f32 %v348_v12, %v348_v12 }
  0xf3   : > { %v562_v17 = vpop.f32.mrf.mxu0 }
  0xf4   : > { %533 = vst [vmem:[%s224_s16] sm:$0xff] %v532_v14   ;;  %v372_v18 = vrot.slane %v371_v15, 4  ;;  %v381_v19 = vadd.f32 %v380_v16, %v379_v13 }
  0xf6   : > { %v373_v20 = vadd.f32 %v372_v18, %v371_v15  ;;  %v382_v21 = vrot.slane %v381_v19, 4 }
  0xf8   : > { %v374_v22 = vrot.slane %v373_v20, 2  ;;  %v383_v23 = vadd.f32 %v382_v21, %v381_v19 }
  0xfa   : > { %v375_v24 = vadd.f32 %v374_v22, %v373_v20  ;;  %v384_v25 = vrot.slane %v383_v23, 2 }
  0xfc   : > { %v376_v26 = vrot.slane %v375_v24, 1  ;;  %v385_v27 = vadd.f32 %v384_v25, %v383_v23 }
  0xfe   : > { %v377_v28 = vadd.f32 %v376_v26, %v375_v24  ;;  %v386_v29 = vrot.slane %v385_v27, 1 }
 0x100   : > { %378 = vst [vmem:[%s229_s20] sm:$0x1] %v377_v28  ;;  %v387_v30 = vadd.f32 %v386_v29, %v385_v27 }
 0x102   : > { %388 = vst [vmem:[%s229_s20 + $0x1] sm:$0x1] %v387_v30 }
 0x103 PF: > { %s14_s14 = sadd.s32 1, %s620_s14   ;;  %s713_s12 = smov %s616_s13 }
 0x104   : > { %p11_p6 = scmp.ge.s32.totalorder %s14_s14, 4   ;;  %s714_s13 = smov %s716_s15 }
 0x106   :  { %13 = sbr.rel (!%p11_p6) target bundleno = 2 (0x2), region = 81 }

// kernel: mlp_classifier_forward.3
= control target key start
LH: loop header
LB: loop body
LE: loop exit
PB: predicated region body
PF: predicated region fallthrough
CT: control target
= control target key end

     0   :  { %s501_s15 = smov 0   ;;  %s555_s0 = inlined_call_operand.vmem [shape: bf16[32,128], index: 0, kind: input, shape index: {}]   ;;  %s556_s1 = inlined_call_operand.vmem [shape: f32[2,128], index: 1, kind: input, shape index: {}]   ;;  %s557_s2 = inlined_call_operand.vmem [shape: bf16[128,128], index: 2, kind: input, shape index: {}]   ;;  %s558_s3 = inlined_call_operand.vmem [shape: f32[1,128], index: 3, kind: input, shape index: {}]   ;;  %s559_s4 = inlined_call_operand.vmem [shape: f32[32,128], index: 4, kind: output, shape index: {}]  }
   0x1 LB: > { %s393_s16 = sadd.s32 4294967295, %s472_s15   ;;  %p397_p0 = scmp.ge.s32.totalorder %s472_s15, 1  ;;  %s472_s15 = sphi %s501_s15, %s14_s15  }
   0x2   : > { %p163_p1 = scmp.lt.s32.totalorder %s472_s15, 3 }
   0x4   : > { %p164_p2 = pnand %p397_p0, %p163_p1 }
   0x5   : > { %s398_s21 = sshll.u32 (!%p164_p2), %s393_s16, 1 }
   0x6   : > { %167 = sbr.rel (%p164_p2) target bundleno = 244 (0xf4), region = 36  ;;  %p190_p3 = scmp.lt.s32.totalorder (!%p164_p2), %s398_s21, 3 }
   0xb   : > { %v458_v0 = vld [vmem:[%s557_s2 + $0x38] sm:$0xff]   ;;  %v474_v1 = vmov 0.0   ;;  %v459_v2 = vld [vmem:[%s557_s2 + $0x30] sm:$0xff]   ;;  %vm475_vm0 = vmmov 0   ;;  %s561_s21 = smov (!%p190_p3, %s398_s21), 3  ;;  %v460_v3 = vld [vmem:[%s557_s2 + $0x28] sm:$0xff]  }
   0xc   : > { %428 = vmatprep.subr.bf16.mxu0 %v474_v1  ;;  %444 = vmatprep.mubr.msk.bf16.mxu0 %vm475_vm0, %v474_v1  ;;  %s399_s24 = sshll.u32 %s561_s21, 2  ;;  %v461_v4 = vld [vmem:[%s557_s2 + $0x20] sm:$0xff]   ;;  %v462_v8 = vld [vmem:[%s557_s2 + $0x18] sm:$0xff]   ;;  %v463_v12 = vld [vmem:[%s557_s2 + $0x10] sm:$0xff]   ;;  %s401_s17 = sshll.u32 %s561_s21, 3 }
   0xd   : > { %429 = vmatpush3.bf16.msra.mxu0 %v458_v0  ;;  %s193_s27 = scalar_lea.vmem %s555_s0, %s399_s24  ;;  %v402_v9 = vld [vmem:[%s556_s1] ss:$0 sm:$0xff]  ;;  %v403_v13 = vld [vmem:[%s556_s1 + $0x1] ss:$0 sm:$0xff]  ;;  %v464_v16 = vld [vmem:[%s557_s2 + $0x8] sm:$0xff]   ;;  %s199_s23 = scalar_lea.vmem %s559_s4, %s401_s17 }
   0xe   : > { %430 = vmatprep.subr.bf16.mxu0 %v474_v1  ;;  %v416_v5 = vld [vmem:[%s193_s27] sm:$0xff]  }
   0xf   : > { %v417_v6 = vunpack.c.l.bf16 %v416_v5  ;;  %v418_v7 = vunpack.c.h.bf16 %v416_v5  ;;  %v465_v19 = vld [vmem:[%s557_s2] sm:$0xff]  }
  0x10   : > { %v404_v21 = vld [vmem:[%s558_s3] ss:$0 sm:$0xff] }
  0x11   : > { %431 = vmatpush3.bf16.msra.mxu0 %v459_v2  ;;  %v212_v10 = vmul.f32 %v417_v6, %v402_v9  ;;  %v213_v11 = vmul.f32 %v418_v7, %v402_v9 }
  0x12   : > { %432 = vmatprep.subr.bf16.mxu0 %v474_v1 }
  0x13   : > { %v218_v14 = vadd.f32 %v403_v13, %v212_v10  ;;  %v219_v15 = vadd.f32 %v403_v13, %v213_v11 }
  0x15   : > { %433 = vmatpush3.bf16.msra.mxu0 %v460_v3  ;;  %v220_v17 = vmax.f32 %v218_v14, 0.0  ;;  %v221_v18 = vmax.f32 %v219_v15, 0.0 }
  0x16   : > { %434 = vmatprep.subr.bf16.mxu0 %v474_v1 }
  0x17   : > { %v222_v20 = vpack.c.bf16 %v221_v18, %v220_v17 }
  0x19   : > { %435 = vmatpush3.bf16.msra.mxu0 %v461_v4 }
  0x1a   : > { %436 = vmatprep.subr.bf16.mxu0 %v474_v1 }
  0x1d   : > { %437 = vmatpush3.bf16.msra.mxu0 %v462_v8 }
  0x1e   : > { %438 = vmatprep.subr.bf16.mxu0 %v474_v1 }
  0x21   : > { %439 = vmatpush3.bf16.msra.mxu0 %v463_v12 }
  0x22   : > { %440 = vmatprep.subr.bf16.mxu0 %v474_v1 }
  0x25   : > { %441 = vmatpush3.bf16.msra.mxu0 %v464_v16 }
  0x26   : > { %442 = vmatprep.subr.bf16.mxu0 %v474_v1 }
  0x29   : > { %443 = vmatpush3.bf16.msra.mxu0 %v465_v19 }
  0x2c   : > { %445 = vmatmul.mubr.bf16.vlgmr.msra.gmra.mxu0 %v222_v20 }
  0xec   : > { %v328_v22 = vpop.f32.mrf.mxu0 }
  0xed   : > { %v329_v23 = vadd.f32 %v404_v21, %v328_v22 }
  0xee   : > { %v446_v24 = vpop.f32.mrf.mxu0 }
  0xef   : > { %335 = vst [vmem:[%s199_s23] sm:$0xff] %v329_v23 }
  0xf0   : > { %v331_v25 = vpop.f32.mrf.mxu0 }
  0xf1   : > { %v332_v26 = vadd.f32 %v404_v21, %v331_v25 }
  0xf2   : > { %v447_v27 = vpop.f32.mrf.mxu0 }
  0xf3   : > { %336 = vst [vmem:[%s199_s23 + $0x8] sm:$0xff] %v332_v26 }
  0xf4 PF: > { %s14_s15 = sadd.s32 1, %s472_s15  }
  0xf5   : > { %p11_p4 = scmp.ge.s32.totalorder %s14_s15, 4  }
  0xf7   :  { %13 = sbr.rel (!%p11_p4) target bundleno = 1 (0x1), region = 66 }

</bundles_post_ra>
